<compile_context>
chip_gen: v7x
topology: tpu7x:2x2x1
jax: 0.10.0
libtpu: 0.0.40
codegen_flags: <defaults>
</compile_context>

<pallas_src>
import functools
import math

import jax
import jax.numpy as jnp
from jax.experimental import pallas as pl
from jax.experimental.pallas import tpu as pltpu

_LANE = 128


def _round_up(a, m):
    return ((a + m - 1) // m) * m


def _sublane_multiple(dtype):
    # Physical VMEM tiles are (8,128) f32 / (16,128) bf16 / (32,128) int8.
    itemsize = jnp.dtype(dtype).itemsize
    return max(8, 32 // max(1, itemsize))


def _vmem_capacity_bytes():
    try:
        return int(pltpu.get_tpu_info().vmem_capacity_bytes)
    except Exception:
        return 64 * 1024 * 1024  # conservative default (v7x per-TC VMEM)


# ----------------------------- kernel bodies ------------------------------ #

def _scale_rows_kernel(keep_ref, x_ref, o_ref, *, inv_keep):
    # keep_ref: (B,) int32 in SMEM (scalar prefetch); x/o: (tr, 128) dense tiles
    b = pl.program_id(0)
    s = keep_ref[b].astype(jnp.float32) * inv_keep
    o_ref[...] = (x_ref[...] * s).astype(o_ref.dtype)


def _scale_rows_fused_kernel(keep_ref, x_ref, res_ref, o_ref, *, inv_keep):
    b = pl.program_id(0)
    s = keep_ref[b].astype(jnp.float32) * inv_keep
    o_ref[...] = (res_ref[...] + x_ref[...] * s).astype(o_ref.dtype)


def _scale_bcast_kernel(scale_ref, x_ref, o_ref):
    # scale_ref: (B, 1) f32 resident across the grid; x/o: (B, tf) tiles
    o_ref[...] = (x_ref[...] * scale_ref[...]).astype(o_ref.dtype)


def _scale_bcast_fused_kernel(scale_ref, x_ref, res_ref, o_ref):
    o_ref[...] = (res_ref[...] + x_ref[...] * scale_ref[...]).astype(o_ref.dtype)


# ------------------------------- wrapper ----------------------------------- #

def drop_path_pallas(x, drop_prob, training, key=None, residual=None):
    """Pallas DropPath forward.  Optionally fuses `out = residual + drop_path(x)`."""
    if drop_prob is None or not training or float(drop_prob) == 0.0:
        return x if residual is None else x + residual

    if key is None:
        # TODO(synk): caller should thread a fresh jax.random key each forward
        # (torch draws from the global RNG); a fixed default repeats the mask.
        key = jax.random.PRNGKey(0)

    if residual is not None and residual.shape != x.shape:
        raise ValueError("residual must have the same shape as x")

    orig_shape = x.shape
    B = x.shape[0]
    F = math.prod(x.shape[1:]) if x.ndim > 1 else 1

    keep_prob = 1.0 - float(drop_prob)
    inv_keep = (1.0 / keep_prob) if keep_prob > 0.0 else 0.0
    keep = jax.random.bernoulli(key, p=keep_prob, shape=(B,)).astype(jnp.int32)

    itemsize = jnp.dtype(x.dtype).itemsize
    sub = _sublane_multiple(x.dtype)

    # ---- chip-aware tile / VMEM sizing ----
    vmem_cap = _vmem_capacity_bytes()
    n_streams = 2 if residual is None else 3            # x, out (, residual)
    # double-buffered: 2 live tiles per stream; keep ~25%+ VMEM headroom.
    target_tile_bytes = max(1 << 20,
                            min(16 << 20, (vmem_cap * 5 // 8) // (2 * n_streams)))
    vmem_limit = int(min(vmem_cap * 3 // 4,
                         2 * n_streams * target_tile_bytes + (4 << 20)))

    x2 = x.reshape(B, F)
    res2 = residual.reshape(B, F) if residual is not None else None

    if F % _LANE == 0 and F >= _LANE:
        # ---------- per-sample path: fully (8,128)-dense tiles ----------
        R = F // _LANE
        rows_target = max(sub, target_tile_bytes // (_LANE * itemsize))
        if R <= rows_target:
            tr = R                                   # full dim (always legal)
        else:
            tr = max(sub, (rows_target // sub) * sub)
        grid = (B, pl.cdiv(R, tr))

        x3 = x2.reshape(B, R, _LANE)
        tile_spec = pl.BlockSpec((None, tr, _LANE), lambda b, r, _k: (b, r, 0))

        in_specs = [tile_spec]
        args = [keep, x3]
        kern = _scale_rows_kernel
        if residual is not None:
            in_specs.append(pl.BlockSpec((None, tr, _LANE),
                                         lambda b, r, _k: (b, r, 0)))
            args.append(res2.reshape(B, R, _LANE))
            kern = _scale_rows_fused_kernel

        out3 = pl.pallas_call(
            functools.partial(kern, inv_keep=inv_keep),
            out_shape=jax.ShapeDtypeStruct((B, R, _LANE), x.dtype),
            grid_spec=pltpu.PrefetchScalarGridSpec(
                num_scalar_prefetch=1,           # keep mask -> SMEM
                grid=grid,
                in_specs=in_specs,
                out_specs=pl.BlockSpec((None, tr, _LANE),
                                       lambda b, r, _k: (b, r, 0)),
            ),
            compiler_params=pltpu.CompilerParams(
                dimension_semantics=("parallel", "parallel"),
                vmem_limit_bytes=vmem_limit,
            ),
        )(*args)
        return out3.reshape(orig_shape)

    # ---------- fallback path (feature count not lane-aligned) ----------
    scale = (keep.astype(jnp.float32) * jnp.float32(inv_keep)).reshape(B, 1)
    B_pad = _round_up(B, sub)                        # account for sublane padding
    tf = (target_tile_bytes // max(1, B_pad * itemsize)) // _LANE * _LANE
    if tf < _LANE or tf >= F:
        tf = F                                       # single full-width block
    grid_f = pl.cdiv(F, tf)

    in_specs = [pl.BlockSpec((B, 1), lambda j: (0, 0)),
                pl.BlockSpec((B, tf), lambda j: (0, j))]
    args = [scale, x2]
    kern = _scale_bcast_kernel
    if residual is not None:
        in_specs.append(pl.BlockSpec((B, tf), lambda j: (0, j)))
        args.append(res2)
        kern = _scale_bcast_fused_kernel

    out2 = pl.pallas_call(
        kern,
        out_shape=jax.ShapeDtypeStruct((B, F), x.dtype),
        grid_spec=pltpu.PrefetchScalarGridSpec(
            num_scalar_prefetch=0,
            grid=(grid_f,),
            in_specs=in_specs,
            out_specs=pl.BlockSpec((B, tf), lambda j: (0, j)),
        ),
        compiler_params=pltpu.CompilerParams(
            dimension_semantics=("parallel",),
            vmem_limit_bytes=vmem_limit,
        ),
    )(*args)
    return out2.reshape(orig_shape)


class DropPath:
    """Mirror of the PyTorch DropPath module (forward only)."""

    def __init__(self, drop_prob=None):
        self.drop_prob = drop_prob
        self.training = True

    def __call__(self, x, key=None, residual=None):
        return drop_path_pallas(x, self.drop_prob, self.training,
                                key=key, residual=residual)


if __name__ == "__main__":
    import numpy as np

    root = jax.random.PRNGKey(0)
    k_data, k_drop, k_res = jax.random.split(root, 3)

    # Transformer-shaped small input: (batch, tokens, hidden)
    B, N, D = 2, 8, 128
    x = jax.random.normal(k_data, (B, N, D), dtype=jnp.float32)

    module = DropPath(drop_prob=0.25)
    module.training = True
    out = jax.block_until_ready(module(x, key=k_drop))

    # Each sample is either all-zero (dropped) or x / keep_prob (kept).
    keep_prob = 1.0 - module.drop_prob
    out_np, x_np = np.asarray(out), np.asarray(x)
    for b in range(B):
        dropped = np.allclose(out_np[b], 0.0)
        kept = np.allclose(out_np[b], x_np[b] / keep_prob, rtol=1e-5, atol=1e-5)
        assert dropped or kept, f"sample {b}: not a valid DropPath output"

    # Fallback path: feature count not a multiple of 128.
    x_small = jax.random.normal(k_data, (2, 5, 7), dtype=jnp.float32)
    out_small = jax.block_until_ready(drop_path_pallas(x_small, 0.5, True, key=k_drop))
    os_np, xs_np = np.asarray(out_small), np.asarray(x_small)
    for b in range(2):
        ok = (np.allclose(os_np[b], 0.0)
              or np.allclose(os_np[b], xs_np[b] / 0.5, rtol=1e-5, atol=1e-5))
        assert ok, f"fallback sample {b}: not a valid DropPath output"

    # Fused residual-add path (same key -> same mask as `out`).
    res = jax.random.normal(k_res, (B, N, D), dtype=jnp.float32)
    out_fused = jax.block_until_ready(
        drop_path_pallas(x, 0.25, True, key=k_drop, residual=res))
    assert np.allclose(np.asarray(out_fused), out_np + np.asarray(res),
                       rtol=1e-5, atol=1e-5)

    # Eval mode -> identity.
    module.training = False
    out_eval = jax.block_until_ready(module(x))
    assert np.allclose(np.asarray(out_eval), x_np)

    # drop_prob == 1.0 -> all paths dropped -> zeros (no division trap).
    out_full = jax.block_until_ready(drop_path_pallas(x, 1.0, True, key=k_drop))
    assert np.allclose(np.asarray(out_full), 0.0)

    print("KERNEL_OK")
</pallas_src>

<mosaic_0001>
module attributes {stable_mosaic.version = 11 : i64} {
  func.func @_scale_rows_kernel(%arg0: i32, %arg1: i32, %arg2: memref<2xi32, #tpu.memory_space<smem>>, %arg3: memref<1x8x128xf32, #tpu.memory_space<vmem>>, %arg4: memref<1x8x128xf32, #tpu.memory_space<vmem>>) attributes {dimension_semantics = [#tpu.dimension_semantics<parallel>, #tpu.dimension_semantics<parallel>], iteration_bounds = array<i64: 2, 1>, scalar_prefetch = 1 : i64, scratch_operands = 0 : i64, tpu.core_type = #tpu.core_type<tc>, window_params = [{transform_indices = @transform_0, window_bounds = array<i64: 1, 8, 128>}, {transform_indices = @transform_1, window_bounds = array<i64: 1, 8, 128>}]} {
    %0 = arith.index_cast %arg0 : i32 to index
    %1 = memref.load %arg2[%0] : memref<2xi32, #tpu.memory_space<smem>>
    %2 = arith.sitofp %1 : i32 to f32
    %cst = arith.constant 1.33333337 : f32
    %3 = arith.mulf %2, %cst : f32
    %c0 = arith.constant 0 : index
    %c0_0 = arith.constant 0 : index
    %c0_1 = arith.constant 0 : index
    %4 = vector.load %arg3[%c0, %c0_0, %c0_1] : memref<1x8x128xf32, #tpu.memory_space<vmem>>, vector<1x8x128xf32>
    %5 = vector.shape_cast %4 : vector<1x8x128xf32> to vector<8x128xf32>
    %6 = vector.broadcast %3 : f32 to vector<8x128xf32>
    %7 = arith.mulf %5, %6 : vector<8x128xf32>
    %c0_2 = arith.constant 0 : index
    %c0_3 = arith.constant 0 : index
    %c0_4 = arith.constant 0 : index
    %8 = vector.load %arg4[%c0_2, %c0_3, %c0_4] : memref<1x8x128xf32, #tpu.memory_space<vmem>>, vector<1x8x128xf32>
    %9 = vector.shape_cast %8 : vector<1x8x128xf32> to vector<8x128xf32>
    %10 = vector.shape_cast %7 : vector<8x128xf32> to vector<1x8x128xf32>
    tpu.vector_store %arg4[%c0_2, %c0_3, %c0_4], %10 {strides = array<i32>} : memref<1x8x128xf32, #tpu.memory_space<vmem>>, vector<1x8x128xf32>,
    return
  }
  func.func @transform_0(%arg0: i32, %arg1: i32, %arg2: memref<2xi32, #tpu.memory_space<smem>>) -> (i32, i32, i32) {
    %c0_i32 = arith.constant 0 : i32
    %c0_i32_0 = arith.constant 0 : i32
    return %arg0, %arg1, %c0_i32 : i32, i32, i32
  }
  func.func @transform_1(%arg0: i32, %arg1: i32, %arg2: memref<2xi32, #tpu.memory_space<smem>>) -> (i32, i32, i32) {
    %c0_i32 = arith.constant 0 : i32
    %c0_i32_0 = arith.constant 0 : i32
    return %arg0, %arg1, %c0_i32 : i32, i32, i32
  }
}

</mosaic_0001>

<bundles_post_ra>
// kernel: tpu_custom_call.1
= control target key start
LH: loop header
LB: loop body
LE: loop exit
PB: predicated region body
PF: predicated region fallthrough
CT: control target
= control target key end

     0   :  { %s661_s0 = inlined_call_operand.hbm [shape: s32[2], index: 0, kind: input, shape index: {}]   ;;  %s662_s1 = inlined_call_operand.hbm [shape: f32[2,8,128], index: 1, kind: input, shape index: {}]   ;;  %s663_s2 = inlined_call_operand.hbm [shape: f32[2,8,128], index: 2, kind: output, shape index: {}]  }
   0x1   :  { %s332_s11 = scalar_lea.hbm %s661_s0, 16 }
   0x2   :  { %p333_p0 = scmp.ne.s32.totalorder %s661_s0, %s332_s11  ;;  %p336_p1 = scmp.lt.u32.totalorder %s332_s11, %s661_s0 }
   0x4   :  { %p338_p2 = pnand %p336_p1, %p333_p0 }
   0x6   :  { %341 = shalt.err (!%p338_p2)  }
   0x7   :  { %s458_s16 = smov [#allocation3]  }
   0x8   :  { %8 = dma.hbm_to_smem %s661_s0, 16, %s458_s16, [#allocation2] }
   0x9   :  { %424 = dma.done.wait [#allocation2], 16 }
   0xa   :  { %425 = vsyncadd [#allocation2], 4294967280 }
   0xb   :  { %10 = sfence }
   0xc   :  { %11 = vsyncpa [#allocation5], 0 }
   0xd   :  { %13 = vsyncpa [#allocation5 + $0x1], 0 }
   0xe   :  { %14 = vsyncpa [#allocation6], 0 }
   0xf   :  { %16 = vsyncpa [#allocation6 + $0x1], 0  ;;  %s488_s19 = smov 0   ;;  %s490_s20 = smov 0  }
  0x10   :  { %s492_s21 = smov 0   ;;  %s494_s22 = smov 0  }
  0x11   :  { %s496_s23 = smov 0   ;;  %s498_s24 = smov 0  }
  0x12 LB: > { %s256_s0 = sadd.s32 4294967295, %s456_s24   ;;  %s257_s25 = sadd.s32 4294967294, %s456_s24   ;;  %s456_s24 = sphi %s498_s24, %s22_s24   ;;  %s452_s23 = sphi %s496_s23, %s679_s23   ;;  %s448_s22 = sphi %s494_s22, %s678_s22   ;;  %s444_s21 = sphi %s492_s21, %s677_s21   ;;  %s440_s20 = sphi %s490_s20, %s676_s20   ;;  %s436_s19 = sphi %s488_s19, %s675_s19  }
  0x13   : > { %s34_s26 = sadd.s32 1, %s452_s23  ;;  %s43_s27 = sadd.s32 1, %s444_s21 }
  0x14   : > { %p36_p3 = scmp.ge.s32.totalorder %s34_s26, 2  ;;  %p50_p4 = scmp.ne.s32.totalorder %s444_s21, %s440_s20 }
  0x15   : > { %p51_p5 = scmp.eq.s32.totalorder %s456_s24, 0  ;;  %p56_p6 = scmp.ne.s32.totalorder %s440_s20, %s436_s19 }
  0x16   : > { %s681_s26 = smov (%p36_p3, %s34_s26), 0  ;;  %p57_p8 = scmp.eq.s32.totalorder %s256_s0, 0 }
  0x17   : > { %p529_p7 = por %p51_p5, %p50_p4  ;;  %s38_s29 = ssub.s32 %s452_s23, %s681_s26 }
  0x18   : > { %p82_p9 = scmp.eq.s32.totalorder %s256_s0, 1  ;;  %p41_p10 = scmp.eq.s32.totalorder %s38_s29, 0 }
  0x19   : > { %p535_p11 = por %p57_p8, %p56_p6  ;;  %p88_p13 = scmp.eq.s32.totalorder %s257_s25, 1 }
  0x1a   : > { %p539_p12 = por %p82_p9, %p50_p4  ;;  %p281_p2 = scmp.lt.s32.totalorder %s456_s24, 2 }
  0x1b   : > { %s544_s4 = scalar_select %p41_p10, %s444_s21, %s43_s27  }
  0x1c   : > { %s667_s3 = scalar_select %p539_p12, 1, 0 }
  0x1d   : > { %p546_p0 = por %p88_p13, %p56_p6  ;;  %s108_s6 = sand.u32 1, %s444_s21  }
  0x1e   : > { %s260_s7 = sshll.u32 %s108_s6, 3  ;;  %s261_s8 = sshll.u32 %s452_s23, 7 }
  0x1f   : > { %s668_s5 = scalar_select %p546_p0, 1, 0 }
  0x20   : > { %s557_s11 = scalar_lea.hbm %s662_s1, %s261_s8  ;;  %s112_s12 = scalar_lea.vmem [#allocation4], %s260_s7 }
  0x21   : > { %s120_s13 = sshll.u32 %s112_s12, 4  ;;  %p563_p3 = pnand %p281_p2, %p529_p7  ;;  %s559_s13 = int_to_ptr.vmem [resolvable:$true] %s120_s13 }
  0x22   : > { %s109_s15 = scalar_lea.sflag [#allocation5], %s108_s6  ;;  %s342_s16 = scalar_lea.hbm %s557_s11, 128 }
  0x23   : > { %p343_p6 = scmp.ne.s32.totalorder %s557_s11, %s342_s16  ;;  %p344_p8 = pneg %p563_p3 }
  0x24   : > { %s347_s0 = scalar_lea.hbm %s662_s1, 256  ;;  %p348_p7 = scmp.lt.u32.totalorder %s557_s11, %s662_s1 }
  0x25   : > { %p345_p9 = pnand %p344_p8, %p343_p6  ;;  %p349_p13 = scmp.lt.u32.totalorder %s347_s0, %s342_s16 }
  0x26   : > { %p351_p1 = scmp.lt.u32.totalorder %s342_s16, %s557_s11 }
  0x27   : > { %p346_p10 = pneg %p345_p9  ;;  %p350_p2 = por %p349_p13, %p348_p7 }
  0x29   : > { %p352_p4 = por %p351_p1, %p350_p2 }
  0x2b   : > { %p353_p5 = pnand %p352_p4, %p346_p10 }
  0x2d   : > { %356 = shalt.err (!%p353_p5)
}
  0x2e   : > { %s357_s28 = scalar_lea.vmem %s559_s13, 128  ;;  %s459_s29 = smov [#allocation4]  }
  0x2f   : > { %p358_p6 = scmp.ne.s32.totalorder %s559_s13, %s357_s28  ;;  %s362_s6 = sshll.u32 %s459_s29, 4  ;;  %s363_s6 = int_to_ptr.vmem [resolvable:$false] %s362_s6 }
  0x30   : > { %s364_s7 = scalar_lea.vmem %s363_s6, 256  ;;  %p365_p12 = scmp.lt.s32.totalorder %s559_s13, %s363_s6 }
  0x31   : > { %p360_p9 = pnand %p358_p6, %p344_p8  ;;  %p366_p7 = scmp.lt.s32.totalorder %s364_s7, %s357_s28 }
  0x33   : > { %p361_p0 = pneg %p360_p9  ;;  %p367_p13 = por %p366_p7, %p365_p12 }
  0x35   : > { %p368_p1 = pnand %p367_p13, %p361_p0 }
  0x37   : > { %371 = shalt.err (!%p368_p1)
}
  0x38   : > { %276 = dma.hbm_to_vmem [thread:$0]  (!%p563_p3), %s557_s11, 128, %s559_s13, %s109_s15  }
  0x39   : > { %p670_p4 = scmp.lt.s32.totalorder %s456_s24, 3  ;;  %p671_p5 = scmp.ge.s32.totalorder %s456_s24, 1 }
  0x3b   : > { %p126_p8 = pnand %p671_p5, %p670_p4 }
  0x3c   : > { %s599_s8 = sand.u32 (!%p126_p8), 1, %s440_s20  }
  0x3d   : > { %129 = sbr.rel (%p126_p8) target bundleno = 97 (0x61), region = 24  ;;  %s263_s9 = sshll.u32 (!%p126_p8), %s599_s8, 3 }
  0x3e   : > { %s132_s10 = scalar_lea.sflag (!%p126_p8), [#allocation5], %s599_s8  ;;  %s135_s12 = scalar_lea.vmem (!%p126_p8), [#allocation4], %s263_s9 }
  0x44   : > { %427 = dma.done.wait (%p535_p11), %s132_s10, 128  }
  0x45   : > { %429 = vsyncadd (%p535_p11), %s132_s10, 4294967168  ;;  %s154_s11 = sld [smem:[#allocation3 + %s448_s22]]  ;;  %s153_s14 = scalar_lea.vmem [#allocation7], %s263_s9  ;;  %v157_v0 = vld [vmem:[%s135_s12] sm:$0xff] }
  0x46   : > { %s176_s15 = sshll.u32 %s153_s14, 4  ;;  %s266_s17 = sshll.u32 %s448_s22, 7  ;;  %s609_s15 = int_to_ptr.vmem [resolvable:$true] %s176_s15 }
  0x47   : > { %s614_s30 = scalar_lea.hbm %s663_s2, %s266_s17  ;;  %s162_s25 = scalar_lea.sflag [#allocation6], %s599_s8 }
  0x48   : > { %s372_s27 = scalar_lea.vmem %s609_s15, 128  ;;  %p672_p12 = scmp.ne.s32.totalorder %s667_s3, 0 }
  0x49   : > { %p373_p11 = scmp.ne.s32.totalorder %s609_s15, %s372_s27  ;;  %s460_s22 = smov [#allocation7]  }
  0x4a   : > { %s376_s28 = sshll.u32 %s460_s22, 4  ;;  %s377_s28 = int_to_ptr.vmem [resolvable:$false] %s376_s28 }
  0x4b   : > { %s155_s13 = scvt.s32.f32 %s154_s11  ;;  %p374_p0 = pnand %p373_p11, %p672_p12 }
  0x4c   : > { %s378_s29 = scalar_lea.vmem %s377_s28, 256  ;;  %p379_p10 = scmp.lt.s32.totalorder %s609_s15, %s377_s28 }
  0x4d   : > { %s156_s16 = smul.f32 1.3333334, %s155_s13  ;;  %p375_p3 = pneg %p374_p0 }
  0x4e   : > { %p380_p2 = scmp.lt.s32.totalorder %s378_s29, %s372_s27 }
  0x4f   : > { %v158_v1 = vstv %s156_s16 }
  0x50   : > { %v159_v2 = vmul.f32 %v158_v1, %v157_v0  ;;  %p381_p6 = por %p380_p2, %p379_p10 }
  0x52   : > { %160 = vst [vmem:[%s153_s14] sm:$0xff] %v159_v2  ;;  %p382_p9 = pnand %p381_p6, %p375_p3 }
  0x54   : > { %385 = shalt.err (!%p382_p9)
}
  0x55   : > { %s386_s6 = scalar_lea.hbm %s614_s30, 128  ;;  %s390_s9 = scalar_lea.hbm %s663_s2, 256 }
  0x56   : > { %p387_p7 = scmp.ne.s32.totalorder %s614_s30, %s386_s6  ;;  %p391_p4 = scmp.lt.u32.totalorder %s614_s30, %s663_s2 }
  0x57   : > { %p392_p5 = scmp.lt.u32.totalorder %s390_s9, %s386_s6  ;;  %p394_p11 = scmp.lt.u32.totalorder %s386_s6, %s614_s30 }
  0x58   : > { %p388_p13 = pnand %p387_p7, %p672_p12 }
  0x59   : > { %p393_p8 = por %p392_p5, %p391_p4 }
  0x5a   : > { %p389_p1 = pneg %p388_p13 }
  0x5b   : > { %p395_p0 = por %p394_p11, %p393_p8 }
  0x5d   : > { %p396_p3 = pnand %p395_p0, %p389_p1 }
  0x5f   : > { %399 = shalt.err (!%p396_p3)
}
  0x60   : > { %271 = dma.vmem_to_hbm [thread:$0]  (%p672_p12), %s609_s15, 128, %s614_s30, %s162_s25  }
  0x61 PF: > { %s188_s11 = sand.u32 1, %s436_s19   ;;  %p673_p10 = scmp.ne.s32.totalorder %s668_s5, 0 }
  0x62   : > { %p674_p2 = scmp.ge.s32.totalorder %s456_s24, 2  ;;  %s189_s13 = scalar_lea.sflag [#allocation6], %s188_s11 }
  0x64   : > { %p278_p6 = pnand %p674_p2, %p673_p10 }
  0x66   : > { %431 = dma.done.wait (!%p278_p6), %s189_s13, 128  }
  0x67   : > { %433 = vsyncadd (!%p278_p6), %s189_s13, 4294967168  ;;  %s22_s24 = sadd.s32 1, %s456_s24   ;;  %s675_s19 = smov %s440_s20 }
  0x68   : > { %p19_p9 = scmp.ge.s32.totalorder %s22_s24, 4   ;;  %s676_s20 = smov %s444_s21 }
  0x69   : > { %s677_s21 = smov %s544_s4  ;;  %s678_s22 = smov %s452_s23 }
  0x6a   : > { %s679_s23 = smov %s681_s26  ;;  %21 = sbr.rel (!%p19_p9) target bundleno = 18 (0x12), region = 69 }
  0x71   :  { %194 = vsyncpa [#allocation5], 1 }
  0x72   :  { %196 = vsyncpa [#allocation5 + $0x1], 1 }
  0x73   :  { %197 = vsyncpa [#allocation6], 1 }
  0x74   :  { %199 = vsyncpa [#allocation6 + $0x1], 1 }

</bundles_post_ra>
